<compile_context>
chip_gen: v6e
topology: v6e:2x2x1
jax: 0.10.0
libtpu: 0.0.40
codegen_flags: <defaults>
</compile_context>

<pallas_src>
import functools

import jax
import jax.numpy as jnp
from jax.experimental import pallas as pl
from jax.experimental.pallas import tpu as pltpu


def _round_up(x: int, m: int) -> int:
    return ((x + m - 1) // m) * m


def _temp_scale_kernel(x_ref, w_ref, b_ref, t_ref, o_ref):
    # logits = model(input): linear classifier on the MXU (f32 accumulate).
    logits = jnp.dot(x_ref[...], w_ref[...],
                     preferred_element_type=jnp.float32)
    # temperature_scale(logits) = logits / T, done as one exact scalar
    # reciprocal (SMEM scalar) + cheap VALU broadcast multiply.
    inv_t = 1.0 / t_ref[0, 0]
    o_ref[...] = (logits + b_ref[...]) * inv_t


@functools.partial(jax.jit, static_argnames=("block_b",))
def model_with_temperature(x, w, b, temperature, *, block_b: int = 1024):
    """Forward pass of ModelWithTemperature.

    x:           (B, H) input features (f32 or bf16)
    w:           (H, C) classifier weight (f32 or bf16)
    b:           (C,)   classifier bias
    temperature: (1,)   temperature parameter (init 1.5)
    returns:     (B, C) float32 temperature-scaled logits
    """
    B, H = x.shape
    C = w.shape[1]

    # Lane-dense output: pad the class dim up to a multiple of 128.
    c_pad = _round_up(C, 128)
    # Batch tile: (8,128)-aligned rows, capped at block_b; pad B up to a
    # whole number of tiles so every grid step is a full block.
    tb = min(block_b, _round_up(B, 8))
    b_pad = _round_up(B, tb)

    if b_pad != B:
        x = jnp.pad(x, ((0, b_pad - B), (0, 0)))
    w_p = jnp.pad(w, ((0, 0), (0, c_pad - C))) if c_pad != C else w
    bias = jnp.pad(b, (0, c_pad - C)) if c_pad != C else b
    bias2 = bias.reshape(1, c_pad).astype(jnp.float32)
    t2 = jnp.asarray(temperature, jnp.float32).reshape(1, 1)

    # Explicit VMEM budget: double-buffered x/out tiles + resident W/bias.
    x_bytes = jnp.dtype(x.dtype).itemsize
    w_bytes = jnp.dtype(w_p.dtype).itemsize
    vmem_bytes = (2 * (tb * H * x_bytes + tb * c_pad * 4)
                  + H * c_pad * w_bytes + c_pad * 4)
    vmem_bytes = min(max(vmem_bytes + (2 << 20), 4 << 20), 48 << 20)

    out = pl.pallas_call(
        _temp_scale_kernel,
        out_shape=jax.ShapeDtypeStruct((b_pad, c_pad), jnp.float32),
        grid=(b_pad // tb,),
        in_specs=[
            pl.BlockSpec((tb, H), lambda i: (i, 0)),          # x tile  -> VMEM
            pl.BlockSpec((H, c_pad), lambda i: (0, 0)),       # W (resident)
            pl.BlockSpec((1, c_pad), lambda i: (0, 0)),       # bias (resident)
            pl.BlockSpec(memory_space=pltpu.MemorySpace.SMEM),  # temperature
        ],
        out_specs=pl.BlockSpec((tb, c_pad), lambda i: (i, 0)),
        compiler_params=pltpu.CompilerParams(
            dimension_semantics=("parallel",),
            vmem_limit_bytes=int(vmem_bytes),
        ),
    )(x, w_p, bias2, t2)

    return out[:B, :C]


if __name__ == "__main__":
    # Small shapes implied by the forward pass: batch=8, hidden=32, classes=16.
    B, H, C = 8, 32, 16

    key = jax.random.PRNGKey(0)
    kx, kw, kb = jax.random.split(key, 3)
    x = jax.random.normal(kx, (B, H), dtype=jnp.float32)
    w = jax.random.normal(kw, (H, C), dtype=jnp.float32) * 0.1
    b = jax.random.normal(kb, (C,), dtype=jnp.float32) * 0.01
    # nn.Parameter(torch.ones(1) * 1.5)
    temperature = jnp.ones((1,), dtype=jnp.float32) * 1.5

    out = model_with_temperature(x, w, b, temperature)
    out = jax.block_until_ready(out)

    ref = (x @ w + b[None, :]) / temperature[0]
    assert out.shape == (B, C)
    assert jnp.allclose(out, ref, atol=1e-5, rtol=1e-5)

    # Second small check: exercises batch padding + a multi-step grid.
    B2 = 40
    x2 = jax.random.normal(jax.random.PRNGKey(1), (B2, H), dtype=jnp.float32)
    out2 = jax.block_until_ready(
        model_with_temperature(x2, w, b, temperature, block_b=16))
    ref2 = (x2 @ w + b[None, :]) / temperature[0]
    assert out2.shape == (B2, C)
    assert jnp.allclose(out2, ref2, atol=1e-5, rtol=1e-5)

    print("KERNEL_OK")
</pallas_src>

<mosaic_0001>
module attributes {stable_mosaic.version = 11 : i64} {
  func.func @_temp_scale_kernel(%arg0: i32, %arg1: memref<8x32xf32, #tpu.memory_space<vmem>>, %arg2: memref<32x128xf32, #tpu.memory_space<vmem>>, %arg3: memref<1x128xf32, #tpu.memory_space<vmem>>, %arg4: memref<1x1xf32, #tpu.memory_space<smem>>, %arg5: memref<8x128xf32, #tpu.memory_space<vmem>>) attributes {dimension_semantics = [#tpu.dimension_semantics<parallel>], iteration_bounds = array<i64: 1>, scalar_prefetch = 0 : i64, scratch_operands = 0 : i64, tpu.core_type = #tpu.core_type<tc>, window_params = [{transform_indices = @transform_0, window_bounds = array<i64: 8, 32>}, {pipeline_mode = #tpu.pipeline_mode<synchronous>, transform_indices = @transform_1, window_bounds = array<i64: 32, 128>}, {pipeline_mode = #tpu.pipeline_mode<synchronous>, transform_indices = @transform_2, window_bounds = array<i64: 1, 128>}, {transform_indices = @transform_3, window_bounds = array<i64: 1, 1>}, {transform_indices = @transform_4, window_bounds = array<i64: 8, 128>}]} {
    %c0 = arith.constant 0 : index
    %c0_0 = arith.constant 0 : index
    %0 = vector.load %arg1[%c0, %c0_0] : memref<8x32xf32, #tpu.memory_space<vmem>>, vector<8x32xf32>
    %c0_1 = arith.constant 0 : index
    %c0_2 = arith.constant 0 : index
    %1 = vector.load %arg2[%c0_1, %c0_2] : memref<32x128xf32, #tpu.memory_space<vmem>>, vector<32x128xf32>
    %cst = arith.constant dense<0.000000e+00> : vector<8x128xf32>
    %2 = tpu.matmul %0, %1, %cst {dimension_numbers = #tpu.dot_dimension_numbers<[1], [0], [0], [1], [0, 0, 1, 1], [], []>} : vector<8x32xf32>, vector<32x128xf32>, vector<8x128xf32> -> vector<8x128xf32>
    %c0_3 = arith.constant 0 : index
    %c0_4 = arith.constant 0 : index
    %3 = memref.load %arg4[%c0_3, %c0_4] : memref<1x1xf32, #tpu.memory_space<smem>>
    %cst_5 = arith.constant 1.000000e+00 : f32
    %4 = arith.divf %cst_5, %3 : f32
    %c0_6 = arith.constant 0 : index
    %c0_7 = arith.constant 0 : index
    %5 = vector.load %arg3[%c0_6, %c0_7] : memref<1x128xf32, #tpu.memory_space<vmem>>, vector<1x128xf32>
    %6 = vector.broadcast %5 : vector<1x128xf32> to vector<8x128xf32>
    %7 = arith.addf %2, %6 : vector<8x128xf32>
    %8 = vector.broadcast %4 : f32 to vector<8x128xf32>
    %9 = arith.mulf %7, %8 : vector<8x128xf32>
    %c0_8 = arith.constant 0 : index
    %c0_9 = arith.constant 0 : index
    %10 = vector.load %arg5[%c0_8, %c0_9] : memref<8x128xf32, #tpu.memory_space<vmem>>, vector<8x128xf32>
    tpu.vector_store %arg5[%c0_8, %c0_9], %9 {strides = array<i32>} : memref<8x128xf32, #tpu.memory_space<vmem>>, vector<8x128xf32>,
    return
  }
  func.func @transform_0(%arg0: i32) -> (i32, i32) {
    %c0_i32 = arith.constant 0 : i32
    %c0_i32_0 = arith.constant 0 : i32
    return %arg0, %c0_i32 : i32, i32
  }
  func.func @transform_1(%arg0: i32) -> (i32, i32) {
    %c0_i32 = arith.constant 0 : i32
    %c0_i32_0 = arith.constant 0 : i32
    %c0_i32_1 = arith.constant 0 : i32
    return %c0_i32, %c0_i32_0 : i32, i32
  }
  func.func @transform_2(%arg0: i32) -> (i32, i32) {
    %c0_i32 = arith.constant 0 : i32
    %c0_i32_0 = arith.constant 0 : i32
    %c0_i32_1 = arith.constant 0 : i32
    return %c0_i32, %c0_i32_0 : i32, i32
  }
  func.func @transform_3(%arg0: i32) -> (i32, i32) {
    %c0_i32 = arith.constant 0 : i32
    %c0_i32_0 = arith.constant 0 : i32
    %c0_i32_1 = arith.constant 0 : i32
    return %c0_i32, %c0_i32_0 : i32, i32
  }
  func.func @transform_4(%arg0: i32) -> (i32, i32) {
    %c0_i32 = arith.constant 0 : i32
    %c0_i32_0 = arith.constant 0 : i32
    return %arg0, %c0_i32 : i32, i32
  }
}

</mosaic_0001>

<bundles_post_ra>
// kernel: model_with_temperature.1
= control target key start
LH: loop header
LB: loop body
LE: loop exit
PB: predicated region body
PF: predicated region fallthrough
CT: control target
= control target key end

     0   :  { %v173_v2 = vmov 0.0   ;;  %vm174_vm0 = vmmov 0   ;;  %s225_s0 = inlined_call_operand.vmem [shape: f32[8,32], index: 0, kind: input, shape index: {}]   ;;  %s226_s1 = inlined_call_operand.vmem [shape: f32[32,128], index: 1, kind: input, shape index: {}]   ;;  %s227_s2 = inlined_call_operand.vmem [shape: f32[1,128], index: 2, kind: input, shape index: {}]   ;;  %s228_s3 = inlined_call_operand.<no memory space> [shape: f32[1,1], index: 3, kind: input, shape index: {}]   ;;  %s229_s4 = inlined_call_operand.hbm [shape: f32[8,128], index: 4, kind: output, shape index: {}]  }
   0x1   :  { %v23_v0 = vld [vmem:[%s226_s1 + $0x18] sm:$0xff]  ;;  %v25_v1 = vstv %s228_s3  ;;  %133 = vmatprep.subr.mxu0 %v173_v2  ;;  %v22_v3 = vld [vmem:[%s226_s1 + $0x10] sm:$0xff]  ;;  %141 = vmatprep.mubr.msk.f32.mxu0 %vm174_vm0, %v173_v2 }
   0x2   :  { %149 = vrcp.f32 %v25_v1  ;;  %134 = vmatpush3.msra.mxu0 %v23_v0 }
   0x3   :  { %10 = vsyncpa [#allocation4], 0  ;;  %135 = vmatprep.subr.mxu0 %v173_v2  ;;  %v21_v4 = vld [vmem:[%s226_s1 + $0x8] sm:$0xff]  ;;  %v20_v5 = vld [vmem:[%s226_s1] sm:$0xff]  ;;  %vm35_vm1 = vcmask 261120   ;;  %s175_s29 = smov [#allocation3]  }
   0x4   :  { %136 = vmatpush3.msra.mxu0 %v22_v3  ;;  %v19_v6 = vld [vmem:[%s225_s0] sm:$0xff]  ;;  %s118_s1 = sshll.u32 %s175_s29, 4  ;;  %s119_s1 = int_to_ptr.vmem [resolvable:$true] %s118_s1 }
   0x5   :  { %137 = vmatprep.subr.mxu0 %v173_v2  ;;  %v126_v8 = vld [vmem:[%s227_s2] ss:$0 sm:$0xff]  ;;  %s151_s0 = scalar_lea.vmem %s119_s1, 128  ;;  %p156_p1 = scmp.lt.s32.totalorder %s119_s1, %s119_s1 }
   0x6   :  { %138 = vmatpush3.msra.mxu0 %v21_v4  ;;  %p152_p0 = scmp.ne.s32.totalorder %s119_s1, %s151_s0  ;;  %p157_p2 = scmp.lt.s32.totalorder %s151_s0, %s151_s0 }
   0x7   :  { %139 = vmatprep.subr.mxu0 %v173_v2 }
   0x8   :  { %140 = vmatpush3.msra.mxu0 %v20_v5  ;;  %p158_p3 = por %p157_p2, %p156_p1 }
   0x9   :  { %142 = vmatmul.mubr.msk.f32.vlgmr.msra.gmra.mxu0 %vm35_vm1, %v19_v6 }
   0xa   :  { %p159_p4 = pnand %p158_p3, %p152_p0 }
   0xf   :  { %v150_v7 = vpop.eup %149 }
  0x10   :  { %144 = vpush %v150_v7 }
  0x41   :  { %s145_s26 = spop %144 }
  0x42   :  { %v109_v10 = vstv %s145_s26 }
  0xc9   :  { %v105_v9 = vpop.f32.mrf.mxu0 }
  0xca   :  { %v106_v11 = vadd.f32 %v126_v8, %v105_v9 }
  0xcb   :  { %v143_v12 = vpop.f32.mrf.mxu0 }
  0xcc   :  { %v110_v13 = vmul.f32 %v109_v10, %v106_v11 }
  0xce   :  { %111 = vst [vmem:[#allocation3] sm:$0xff] %v110_v13 }
  0xcf   :  { %162 = shalt.err (!%p159_p4)
}
  0xd0   :  { %121 = dma.vmem_to_hbm [thread:$0]  %s119_s1, 128, %s229_s4, [#allocation4]  }
  0xd1   :  { %171 = dma.done.wait [#allocation4], 128  }
  0xd2   :  { %172 = vsyncadd [#allocation4], 4294967168 }
  0xd3   :  { %125 = vsyncpa [#allocation4], 1 }

</bundles_post_ra>
